<compile_context>
chip_gen: v6e
topology: v6e:2x2x1
jax: 0.10.0
libtpu: 0.0.40
codegen_flags: <defaults>
</compile_context>

<pallas_src>
import functools
import math

import jax
import jax.numpy as jnp
from jax import lax
from jax.experimental import pallas as pl
from jax.experimental.pallas import tpu as pltpu


# ----------------------------- kernel bodies --------------------------------

def _ln_kernel_affine(x_ref, wb_ref, o_ref, *, eps):
    """LayerNorm + affine over the last axis of one (bm, D) row tile.

    x_ref : (bm, D) input tile (any float dtype)
    wb_ref: (2, D)  f32, row 0 = weight, row 1 = bias (resident across the grid)
    o_ref : (bm, D) output tile, same dtype as the input
    """
    x = x_ref[...].astype(jnp.float32)
    mean = jnp.mean(x, axis=-1, keepdims=True)
    xc = x - mean
    var = jnp.mean(xc * xc, axis=-1, keepdims=True)
    inv = lax.rsqrt(var + eps)                                   # EUP, no divide
    o_ref[...] = (xc * inv * wb_ref[0:1, :] + wb_ref[1:2, :]).astype(o_ref.dtype)


def _ln_kernel_plain(x_ref, o_ref, *, eps):
    """LayerNorm (no affine) over the last axis of one (bm, D) row tile."""
    x = x_ref[...].astype(jnp.float32)
    mean = jnp.mean(x, axis=-1, keepdims=True)
    xc = x - mean
    var = jnp.mean(xc * xc, axis=-1, keepdims=True)
    inv = lax.rsqrt(var + eps)
    o_ref[...] = (xc * inv).astype(o_ref.dtype)


# ----------------------------- tiling policy --------------------------------

_VMEM_TILE_BUDGET = 40 * 1024 * 1024   # conservative: fits v5e / v6e / v7x
_VMEM_LIMIT_BYTES = 48 * 1024 * 1024   # scoped VMEM limit (headroom over budget)
_TARGET_IN_BYTES = 4 * 1024 * 1024     # >= ~4 MiB of input moved per grid step


def _sublane(dtype):
    # sublane packing: 8 rows for 4-byte, 16 for 2-byte, 32 for 1-byte dtypes
    return max(8, 32 // jnp.dtype(dtype).itemsize)


def _choose_block_rows(M, D, dtype):
    itemsize = jnp.dtype(dtype).itemsize
    sub = _sublane(dtype)
    # VMEM per row: double-buffered in + out (input dtype) + ~2 f32 full-tile temps
    per_row = D * (4 * itemsize + 8)
    bm = max(sub, _VMEM_TILE_BUDGET // per_row)
    # amortize per-step overhead: aim for >= _TARGET_IN_BYTES of input per step
    bm = min(bm, max(sub, _TARGET_IN_BYTES // (D * itemsize)))
    # never wider than the (sublane-rounded) number of rows
    bm = min(bm, pl.cdiv(M, sub) * sub)
    # >= 2 grid steps when M allows, so v7x megacore can shard the row axis
    half = ((M // 2) // sub) * sub
    if half >= sub:
        bm = min(bm, half)
    # round down to the dtype's sublane packing
    bm = max(sub, (bm // sub) * sub)
    return int(bm)


# ------------------------------- wrapper -------------------------------------

def llmc_layer_norm_forward(x, normalized_shape, weight=None, bias=None, eps=1e-5):
    """JAX/Pallas equivalent of LlmcLayerNorm.forward (F.layer_norm)."""
    if isinstance(normalized_shape, int):
        normalized_shape = (normalized_shape,)
    n_norm = len(normalized_shape)
    assert tuple(x.shape[-n_norm:]) == tuple(normalized_shape), \
        "trailing dims of x must equal normalized_shape"

    D = math.prod(normalized_shape)
    lead = x.shape[:-n_norm]
    M = math.prod(lead) if lead else 1
    out_dtype = x.dtype
    itemsize = jnp.dtype(x.dtype).itemsize

    x2 = x.reshape(M, D)
    bm = _choose_block_rows(M, D, x.dtype)
    grid = (pl.cdiv(M, bm),)          # partial last block handled by Pallas masking

    has_affine = (weight is not None) or (bias is not None)

    cost = pl.CostEstimate(
        flops=int(7 * M * D),
        transcendentals=int(M),
        bytes_accessed=int(2 * M * D * itemsize + (2 * D * 4 if has_affine else 0)),
    )
    cparams = pltpu.CompilerParams(
        dimension_semantics=("parallel",),
        vmem_limit_bytes=_VMEM_LIMIT_BYTES,
    )

    x_spec = pl.BlockSpec((bm, D), lambda i: (i, 0))
    o_spec = pl.BlockSpec((bm, D), lambda i: (i, 0))

    if has_affine:
        w = (jnp.ones((D,), jnp.float32) if weight is None
             else weight.reshape(D).astype(jnp.float32))
        b = (jnp.zeros((D,), jnp.float32) if bias is None
             else bias.reshape(D).astype(jnp.float32))
        wb = jnp.stack([w, b], axis=0)                      # (2, D), one resident DMA
        kernel = functools.partial(_ln_kernel_affine, eps=float(eps))
        y = pl.pallas_call(
            kernel,
            out_shape=jax.ShapeDtypeStruct((M, D), out_dtype),
            grid=grid,
            in_specs=[x_spec,
                      pl.BlockSpec((2, D), lambda i: (0, 0))],   # weight+bias resident
            out_specs=o_spec,
            compiler_params=cparams,
            cost_estimate=cost,
        )(x2, wb)
    else:
        kernel = functools.partial(_ln_kernel_plain, eps=float(eps))
        y = pl.pallas_call(
            kernel,
            out_shape=jax.ShapeDtypeStruct((M, D), out_dtype),
            grid=grid,
            in_specs=[x_spec],
            out_specs=o_spec,
            compiler_params=cparams,
            cost_estimate=cost,
        )(x2)

    return y.reshape(x.shape)


# ------------------------------- reference -----------------------------------

def _reference(x, normalized_shape, weight, bias, eps):
    """Pure-JAX reference of F.layer_norm."""
    if isinstance(normalized_shape, int):
        normalized_shape = (normalized_shape,)
    D = math.prod(normalized_shape)
    xf = x.reshape(-1, D).astype(jnp.float32)
    mean = jnp.mean(xf, axis=-1, keepdims=True)
    var = jnp.mean((xf - mean) ** 2, axis=-1, keepdims=True)
    y = (xf - mean) / jnp.sqrt(var + eps)
    if weight is not None:
        y = y * weight.reshape(1, D).astype(jnp.float32)
    if bias is not None:
        y = y + bias.reshape(1, D).astype(jnp.float32)
    return y.astype(x.dtype).reshape(x.shape)


# --------------------------------- demo ---------------------------------------

if __name__ == "__main__":
    eps = 1e-5
    batch, seq, hidden = 2, 8, 256
    normalized_shape = (hidden,)

    key = jax.random.PRNGKey(0)
    kx, kw, kb, kr = jax.random.split(key, 4)

    x = jax.random.normal(kx, (batch, seq, hidden), jnp.float32)
    weight = jax.random.normal(kw, (hidden,), jnp.float32) * 0.1 + 1.0
    bias = jax.random.normal(kb, (hidden,), jnp.float32) * 0.1

    # elementwise_affine=True path (weight + bias).
    y = jax.block_until_ready(
        llmc_layer_norm_forward(x, normalized_shape, weight, bias, eps))
    y_ref = _reference(x, normalized_shape, weight, bias, eps)
    assert y.shape == x.shape and y.dtype == x.dtype
    assert jnp.allclose(y, y_ref, rtol=1e-4, atol=1e-4), "mismatch (affine)"

    # bias=None path (module constructed with bias=None).
    y_nb = jax.block_until_ready(
        llmc_layer_norm_forward(x, normalized_shape, weight, None, eps))
    assert jnp.allclose(y_nb, _reference(x, normalized_shape, weight, None, eps),
                        rtol=1e-4, atol=1e-4), "mismatch (no bias)"

    # No-affine path + ragged row count (exercises the masked partial last block).
    x_r = jax.random.normal(kr, (3, 5, hidden), jnp.float32)
    y_r = jax.block_until_ready(
        llmc_layer_norm_forward(x_r, normalized_shape, None, None, eps))
    assert jnp.allclose(y_r, _reference(x_r, normalized_shape, None, None, eps),
                        rtol=1e-4, atol=1e-4), "mismatch (no affine, ragged M)"

    # bf16 input (16-row sublane packing), affine.
    x_bf = x.astype(jnp.bfloat16)
    y_bf = jax.block_until_ready(
        llmc_layer_norm_forward(x_bf, normalized_shape, weight, bias, eps))
    assert y_bf.dtype == jnp.bfloat16
    assert jnp.allclose(y_bf.astype(jnp.float32),
                        _reference(x_bf, normalized_shape, weight, bias, eps)
                        .astype(jnp.float32),
                        rtol=2e-2, atol=2e-2), "mismatch (bf16)"

    print("KERNEL_OK")
</pallas_src>

<mosaic_0001>
module attributes {stable_mosaic.version = 11 : i64} {
  func.func @_ln_kernel_affine(%arg0: i32, %arg1: memref<8x256xf32, #tpu.memory_space<vmem>>, %arg2: memref<2x256xf32, #tpu.memory_space<vmem>>, %arg3: memref<8x256xf32, #tpu.memory_space<vmem>>) attributes {dimension_semantics = [#tpu.dimension_semantics<parallel>], iteration_bounds = array<i64: 2>, scalar_prefetch = 0 : i64, scratch_operands = 0 : i64, tpu.core_type = #tpu.core_type<tc>, window_params = [{transform_indices = @transform_0, window_bounds = array<i64: 8, 256>}, {pipeline_mode = #tpu.pipeline_mode<synchronous>, transform_indices = @transform_1, window_bounds = array<i64: 2, 256>}, {transform_indices = @transform_2, window_bounds = array<i64: 8, 256>}]} {
    %c0 = arith.constant 0 : index
    %c0_0 = arith.constant 0 : index
    %0 = vector.load %arg1[%c0, %c0_0] : memref<8x256xf32, #tpu.memory_space<vmem>>, vector<8x256xf32>
    %cst = arith.constant dense<0.000000e+00> : vector<8xf32>
    %1 = vector.multi_reduction <add>, %0, %cst [1] : vector<8x256xf32> to vector<8xf32>
    %2 = vector.shape_cast %1 : vector<8xf32> to vector<8x1xf32>
    %cst_1 = arith.constant 2.560000e+02 : f32
    %3 = vector.broadcast %cst_1 : f32 to vector<8x1xf32>
    %4 = arith.divf %2, %3 : vector<8x1xf32>
    %5 = vector.broadcast %4 : vector<8x1xf32> to vector<8x256xf32>
    %6 = arith.subf %0, %5 : vector<8x256xf32>
    %7 = arith.mulf %6, %6 : vector<8x256xf32>
    %cst_2 = arith.constant dense<0.000000e+00> : vector<8xf32>
    %8 = vector.multi_reduction <add>, %7, %cst_2 [1] : vector<8x256xf32> to vector<8xf32>
    %9 = vector.shape_cast %8 : vector<8xf32> to vector<8x1xf32>
    %cst_3 = arith.constant 2.560000e+02 : f32
    %10 = vector.broadcast %cst_3 : f32 to vector<8x1xf32>
    %11 = arith.divf %9, %10 : vector<8x1xf32>
    %cst_4 = arith.constant 9.99999974E-6 : f32
    %12 = vector.broadcast %cst_4 : f32 to vector<8x1xf32>
    %13 = arith.addf %11, %12 : vector<8x1xf32>
    %14 = math.rsqrt %13 : vector<8x1xf32>
    %15 = vector.broadcast %14 : vector<8x1xf32> to vector<8x256xf32>
    %16 = arith.mulf %6, %15 : vector<8x256xf32>
    %c0_5 = arith.constant 0 : index
    %c0_6 = arith.constant 0 : index
    %17 = vector.load %arg2[%c0_5, %c0_6] : memref<2x256xf32, #tpu.memory_space<vmem>>, vector<1x256xf32>
    %18 = vector.broadcast %17 : vector<1x256xf32> to vector<8x256xf32>
    %19 = arith.mulf %16, %18 : vector<8x256xf32>
    %c1 = arith.constant 1 : index
    %c0_7 = arith.constant 0 : index
    %20 = vector.load %arg2[%c1, %c0_7] : memref<2x256xf32, #tpu.memory_space<vmem>>, vector<1x256xf32>
    %21 = vector.broadcast %20 : vector<1x256xf32> to vector<8x256xf32>
    %22 = arith.addf %19, %21 : vector<8x256xf32>
    %c0_8 = arith.constant 0 : index
    %c0_9 = arith.constant 0 : index
    %23 = vector.load %arg3[%c0_8, %c0_9] : memref<8x256xf32, #tpu.memory_space<vmem>>, vector<8x256xf32>
    tpu.vector_store %arg3[%c0_8, %c0_9], %22 {strides = array<i32>} : memref<8x256xf32, #tpu.memory_space<vmem>>, vector<8x256xf32>,
    return
  }
  func.func @transform_0(%arg0: i32) -> (i32, i32) {
    %c0_i32 = arith.constant 0 : i32
    %c0_i32_0 = arith.constant 0 : i32
    return %arg0, %c0_i32 : i32, i32
  }
  func.func @transform_1(%arg0: i32) -> (i32, i32) {
    %c0_i32 = arith.constant 0 : i32
    %c0_i32_0 = arith.constant 0 : i32
    %c0_i32_1 = arith.constant 0 : i32
    return %c0_i32, %c0_i32_0 : i32, i32
  }
  func.func @transform_2(%arg0: i32) -> (i32, i32) {
    %c0_i32 = arith.constant 0 : i32
    %c0_i32_0 = arith.constant 0 : i32
    return %arg0, %c0_i32 : i32, i32
  }
}

</mosaic_0001>

<bundles_post_ra>
// kernel: tpu_custom_call.1
= control target key start
LH: loop header
LB: loop body
LE: loop exit
PB: predicated region body
PF: predicated region fallthrough
CT: control target
= control target key end

     0   :  { %7 = vsyncpa [#allocation3], 0  ;;  %s713_s0 = inlined_call_operand.hbm [shape: f32[16,256], index: 0, kind: input, shape index: {}]   ;;  %s714_s1 = inlined_call_operand.hbm [shape: f32[2,256], index: 1, kind: input, shape index: {}]   ;;  %s715_s2 = inlined_call_operand.hbm [shape: f32[16,256], index: 2, kind: output, shape index: {}]  }
   0x1   :  { %9 = vsyncpa [#allocation3 + $0x1], 0 }
   0x2   :  { %10 = vsyncpa [#allocation6], 0 }
   0x3   :  { %11 = vsyncpa [#allocation4], 0 }
   0x4   :  { %13 = vsyncpa [#allocation4 + $0x1], 0  ;;  %s537_s9 = smov 0   ;;  %s539_s10 = smov 0  }
   0x5   :  { %s541_s11 = smov 0   ;;  %s543_s12 = smov 0  }
   0x6 LB: > { %s558_s13 = sadd.s32 4294967295, %s517_s12   ;;  %s318_s14 = sadd.s32 4294967294, %s517_s12   ;;  %s517_s12 = sphi %s543_s12, %s738_s12   ;;  %s513_s11 = sphi %s541_s11, %s737_s11   ;;  %s509_s10 = sphi %s539_s10, %s736_s10   ;;  %s505_s9 = sphi %s537_s9, %s735_s9  }
   0x7   : > { %p39_p0 = scmp.ne.s32.totalorder %s509_s10, %s505_s9  ;;  %p716_p1 = scmp.eq.s32.totalorder %s558_s13, 0 }
   0x8   : > { %p90_p3 = scmp.eq.s32.totalorder %s318_s14, 1  ;;  %p319_p5 = scmp.ge.s32.totalorder %s517_s12, 1 }
   0x9   : > { %p567_p4 = por %p716_p1, %p39_p0  ;;  %p97_p7 = scmp.lt.s32.totalorder %s517_s12, 3 }
   0xa   : > { %p572_p6 = por %p90_p3, %p39_p0  ;;  %s519_s18 = smov [#allocation5]  }
   0xb   : > { %s720_s15 = scalar_select %p567_p4, 1, 0 }
   0xc   : > { %s721_s16 = scalar_select %p572_p6, 1, 0 }
   0xd   : > { %p577_p8 = pnand %p319_p5, %p97_p7  ;;  %s110_s19 = sshll.u32 %s519_s18, 4  ;;  %s111_s19 = int_to_ptr.vmem [resolvable:$true] %s110_s19 }
   0xe   : > { %s585_s20 = sadd.s32 1, %s517_s12   ;;  %s26_s24 = sadd.s32 1, %s513_s11 }
   0xf   : > { %s722_s17 = scalar_select %p577_p8, 1, 0 }
  0x10   : > { %p344_p10 = pneg %p577_p8  ;;  %s23_s22 = ssub.s32 %s517_s12, %s585_s20 }
  0x11   : > { %p595_p12 = scmp.eq.s32.totalorder %s23_s22, 0  ;;  %p33_p13 = scmp.ne.s32.totalorder %s513_s11, %s509_s10 }
  0x12   : > { %p589_p11 = pnand %p344_p10, %p716_p1  ;;  %s406_s25 = scalar_lea.vmem %s111_s19, 64 }
  0x13   : > { %p407_p3 = scmp.ne.s32.totalorder %s111_s19, %s406_s25  ;;  %p414_p9 = scmp.lt.s32.totalorder %s111_s19, %s111_s19 }
  0x14   : > { %p397_p0 = pneg %p589_p11  ;;  %p415_p2 = scmp.lt.s32.totalorder %s406_s25, %s406_s25 }
  0x16   : > { %p409_p5 = pnand %p407_p3, %p397_p0  ;;  %p416_p10 = por %p415_p2, %p414_p9 }
  0x18   : > { %p410_p7 = pneg %p409_p5 }
  0x1a   : > { %p417_p1 = pnand %p416_p10, %p410_p7 }
  0x1c   : > { %420 = shalt.err (!%p417_p1)
}
  0x1d   : > { %347 = dma.hbm_to_vmem [thread:$0]  (!%p589_p11), %s714_s1, 64, %s111_s19, [#allocation6]  }
  0x1e   : > { %s612_s28 = scalar_select %p595_p12, %s513_s11, %s26_s24  }
  0x1f   : > { %p34_p1 = scmp.eq.s32.totalorder %s517_s12, 0  ;;  %p725_p2 = scmp.eq.s32.totalorder %s558_s13, 1 }
  0x20   : > { %p357_p0 = scmp.lt.s32.totalorder %s517_s12, 2  ;;  %s121_s30 = sand.u32 1, %s513_s11  }
  0x21   : > { %p620_p9 = por %p725_p2, %p33_p13  ;;  %p35_p3 = por %p34_p1, %p33_p13 }
  0x22   : > { %s322_s3 = sshll.u32 %s121_s30, 4  ;;  %s334_s4 = sshll.u32 %s517_s12, 8 }
  0x23   : > { %s726_s29 = scalar_select %p620_p9, 1, 0 }
  0x24   : > { %s633_s7 = scalar_lea.hbm %s713_s0, %s334_s4  ;;  %s125_s8 = scalar_lea.vmem [#allocation2], %s322_s3 }
  0x25   : > { %s133_s14 = sshll.u32 %s125_s8, 4  ;;  %p635_p11 = pnand %p357_p0, %p35_p3  ;;  %s134_s14 = int_to_ptr.vmem [resolvable:$true] %s133_s14 }
  0x26   : > { %s122_s19 = scalar_lea.sflag [#allocation3], %s121_s30  ;;  %s421_s21 = scalar_lea.hbm %s633_s7, 256 }
  0x27   : > { %p422_p12 = scmp.ne.s32.totalorder %s633_s7, %s421_s21  ;;  %p423_p13 = pneg %p635_p11 }
  0x28   : > { %s426_s24 = scalar_lea.hbm %s713_s0, 512  ;;  %p427_p10 = scmp.lt.s32.totalorder %s633_s7, %s713_s0 }
  0x29   : > { %p424_p5 = pnand %p423_p13, %p422_p12  ;;  %p428_p1 = scmp.lt.s32.totalorder %s426_s24, %s421_s21 }
  0x2b   : > { %p425_p7 = pneg %p424_p5  ;;  %p429_p2 = por %p428_p1, %p427_p10 }
  0x2d   : > { %p430_p0 = pnand %p429_p2, %p425_p7 }
  0x2f   : > { %433 = shalt.err (!%p430_p0)
}
  0x30   : > { %s434_s27 = scalar_lea.vmem %s134_s14, 256  ;;  %s520_s30 = smov [#allocation2]  }
  0x31   : > { %p435_p3 = scmp.ne.s32.totalorder %s134_s14, %s434_s27  ;;  %s439_s3 = sshll.u32 %s520_s30, 4  ;;  %s440_s3 = int_to_ptr.vmem [resolvable:$false] %s439_s3 }
  0x32   : > { %s441_s4 = scalar_lea.vmem %s440_s3, 512  ;;  %p442_p12 = scmp.lt.s32.totalorder %s134_s14, %s440_s3 }
  0x33   : > { %p437_p6 = pnand %p435_p3, %p423_p13  ;;  %p443_p5 = scmp.lt.s32.totalorder %s441_s4, %s434_s27 }
  0x35   : > { %p438_p9 = pneg %p437_p6  ;;  %p444_p4 = por %p443_p5, %p442_p12 }
  0x37   : > { %p445_p8 = pnand %p444_p4, %p438_p9 }
  0x39   : > { %448 = shalt.err (!%p445_p8)
}
  0x3a   : > { %351 = dma.hbm_to_vmem [thread:$0]  (!%p635_p11), %s633_s7, 256, %s134_s14, %s122_s19  }
  0x3b   : > { %p728_p7 = scmp.ne.s32.totalorder %s722_s17, 0 }
  0x3c   : > { %s656_s5 = sand.u32 (!%p728_p7), 1, %s509_s10   ;;  %p729_p4 = scmp.ne.s32.totalorder (!%p728_p7), %s720_s15, 0 }
  0x3d   : > { %142 = sbr.rel (%p728_p7) target bundleno = 394 (0x18a), region = 28  ;;  %s326_s6 = sshll.u32 (!%p728_p7), %s656_s5, 4 }
  0x3e   : > { %s145_s8 = scalar_lea.sflag (!%p728_p7), [#allocation3], %s656_s5  ;;  %s148_s21 = scalar_lea.vmem (!%p728_p7), [#allocation2], %s326_s6 }
  0x42   : > { %492 = dma.done.wait (%p729_p4), %s145_s8, 256  }
  0x43   : > { %494 = vsyncadd (%p729_p4), %s145_s8, 4294967040  ;;  %p730_p6 = scmp.eq.s32.totalorder %s558_s13, 0 }
  0x45   : > { %496 = dma.done.wait (%p730_p6), [#allocation6], 64   ;;  %p731_p8 = pmov %p730_p6 }
  0x46   : > { %v173_v0 = vld [vmem:[%s148_s21] sm:$0xff]  ;;  %v174_v1 = vld [vmem:[%s148_s21 + $0x8] sm:$0xff]  ;;  %v194_v13 = vlaneseq  ;;  %s335_s15 = sshll.u32 %s558_s13, 8  ;;  %s172_s17 = scalar_lea.vmem [#allocation7], %s326_s6 }
  0x47   : > { %498 = vsyncadd (%p731_p8), [#allocation6], 4294967232  ;;  %v175_v2 = vadd.f32 %v174_v1, %v173_v0  ;;  %v192_v17 = vld [vmem:[#allocation5] ss:$2 sm:$0x3]  ;;  %s238_s7 = sshll.u32 %s172_s17, 4  ;;  %s676_s19 = scalar_lea.hbm %s715_s2, %s335_s15  ;;  %s239_s7 = int_to_ptr.vmem [resolvable:$true] %s238_s7 }
  0x48   : > { %v195_v14 = vshrl.u32 %v194_v13, 7  ;;  %v207_v18 = vld [vmem:[#allocation5 + $0x1] ss:$2 sm:$0x3]  ;;  %s224_s22 = scalar_lea.sflag [#allocation4], %s656_s5  ;;  %s449_s23 = scalar_lea.vmem %s239_s7, 256 }
  0x49   : > { %176 = vadd.xlane.f32.xlu0 %v175_v2  ;;  %p450_p9 = scmp.ne.s32.totalorder %s239_s7, %s449_s23  ;;  %p732_p11 = scmp.ne.s32.totalorder %s726_s29, 0 }
  0x4a   : > { %v196_v15 = vsub.s32 0, %v195_v14  ;;  %v200_v16 = vsub.s32 1, %v195_v14  ;;  %s521_s13 = smov [#allocation7]  }
  0x4b   : > { %p451_p13 = pnand %p450_p9, %p732_p11  ;;  %s453_s24 = sshll.u32 %s521_s13, 4  ;;  %s454_s24 = int_to_ptr.vmem [resolvable:$false] %s453_s24 }
  0x4c   : > { %v197_v19 = vrot.slane %v192_v17, %v196_v15  ;;  %v201_v20 = vrot.slane %v192_v17, %v200_v16  ;;  %v212_v24 = vrot.slane %v207_v18, %v196_v15  ;;  %v216_v25 = vrot.slane %v207_v18, %v200_v16  ;;  %s455_s25 = scalar_lea.vmem %s454_s24, 512  ;;  %p456_p1 = scmp.lt.s32.totalorder %s239_s7, %s454_s24 }
  0x4d   : > { %p452_p10 = pneg %p451_p13  ;;  %p457_p2 = scmp.lt.s32.totalorder %s455_s25, %s449_s23 }
  0x4f   : > { %p458_p0 = por %p457_p2, %p456_p1 }
  0x51   : > { %p459_p3 = pnand %p458_p0, %p452_p10 }
  0xd2   : > { %v177_v3 = vpop.xlane.xlu0 %176 }
  0xd3   : > { %v179_v4 = vmul.f32 0.00390625, %v177_v3 }
  0xd5   : > { %v180_v5 = vsub.f32 %v173_v0, %v179_v4  ;;  %v181_v6 = vsub.f32 %v174_v1, %v179_v4 }
  0xd7   : > { %v182_v7 = vmul.f32 %v180_v5, %v180_v5  ;;  %v183_v8 = vmul.f32 %v181_v6, %v181_v6 }
  0xd9   : > { %v184_v9 = vadd.f32 %v183_v8, %v182_v7 }
  0xdb   : > { %185 = vadd.xlane.f32.xlu0 %v184_v9 }
 0x164   : > { %v186_v10 = vpop.xlane.xlu0 %185 }
 0x165   : > { %v187_v11 = vmul.f32 0.00390625, %v186_v10 }
 0x167   : > { %v188_v12 = vadd.f32 1e-05, %v187_v11 }
 0x169   : > { %393 = vrsqrt.f32 %v188_v12 }
 0x176   : > { %v394_v21 = vpop.eup %393 }
 0x177   : > { %v190_v22 = vmul.f32 %v394_v21, %v180_v5  ;;  %v191_v23 = vmul.f32 %v394_v21, %v181_v6 }
 0x179   : > { %v204_v26 = vmul.f32 %v197_v19, %v190_v22  ;;  %v205_v27 = vmul.f32 %v201_v20, %v191_v23 }
 0x17b   : > { %v219_v28 = vadd.f32 %v212_v24, %v204_v26  ;;  %v220_v29 = vadd.f32 %v216_v25, %v205_v27 }
 0x17d   : > { %221 = vst [vmem:[%s172_s17] sm:$0xff] %v219_v28  ;;  %222 = vst [vmem:[%s172_s17 + $0x8] sm:$0xff] %v220_v29 }
 0x17e   : > { %462 = shalt.err (!%p459_p3)
}
 0x17f   : > { %s463_s26 = scalar_lea.hbm %s676_s19, 256  ;;  %s467_s3 = scalar_lea.hbm %s715_s2, 512 }
 0x180   : > { %p464_p12 = scmp.ne.s32.totalorder %s676_s19, %s463_s26  ;;  %p468_p4 = scmp.lt.s32.totalorder %s676_s19, %s715_s2 }
 0x181   : > { %p469_p6 = scmp.lt.s32.totalorder %s467_s3, %s463_s26 }
 0x182   : > { %p465_p5 = pnand %p464_p12, %p732_p11 }
 0x183   : > { %p470_p8 = por %p469_p6, %p468_p4 }
 0x184   : > { %p466_p7 = pneg %p465_p5 }
 0x186   : > { %p471_p9 = pnand %p470_p8, %p466_p7 }
 0x188   : > { %474 = shalt.err (!%p471_p9)
}
 0x189   : > { %342 = dma.vmem_to_hbm [thread:$0]  (%p732_p11), %s239_s7, 256, %s676_s19, %s224_s22  }
 0x18a PF: > { %s250_s6 = sand.u32 1, %s505_s9   ;;  %p733_p13 = scmp.ne.s32.totalorder %s721_s16, 0 }
 0x18b   : > { %p734_p10 = scmp.ge.s32.totalorder %s517_s12, 2  ;;  %s251_s8 = scalar_lea.sflag [#allocation4], %s250_s6 }
 0x18d   : > { %p353_p1 = pnand %p734_p10, %p733_p13 }
 0x18f   : > { %p354_p2 = pneg %p353_p1 }
 0x191   : > { %500 = dma.done.wait (%p354_p2), %s251_s8, 256  }
 0x192   : > { %502 = vsyncadd (%p354_p2), %s251_s8, 4294967040  ;;  %p16_p0 = scmp.ge.s32.totalorder %s585_s20, 4   ;;  %s735_s9 = smov %s509_s10 }
 0x193   : > { %s736_s10 = smov %s513_s11  ;;  %s737_s11 = smov %s612_s28 }
 0x194   : > { %s738_s12 = smov %s585_s20  ;;  %18 = sbr.rel (!%p16_p0) target bundleno = 6 (0x6), region = 78 }
 0x199   :  { %256 = vsyncpa [#allocation3], 1 }
 0x19a   :  { %258 = vsyncpa [#allocation3 + $0x1], 1 }
 0x19b   :  { %259 = vsyncpa [#allocation6], 1 }
 0x19c   :  { %260 = vsyncpa [#allocation4], 1 }
 0x19d   :  { %262 = vsyncpa [#allocation4 + $0x1], 1 }

</bundles_post_ra>
